<compile_context>
chip_gen: v7x
topology: tpu7x:2x2x1
jax: 0.10.0
libtpu: 0.0.40
codegen_flags: <defaults>
</compile_context>

<pallas_src>
import functools

import jax
import jax.numpy as jnp
from jax.experimental import pallas as pl
from jax.experimental.pallas import tpu as pltpu

LANE = 128
F32 = jnp.float32
BF16 = jnp.bfloat16

# 48 MiB is safe on all generations (v7x: 64 MiB physical).  Raise to ~96 MiB
# on v5e/v6e (128 MiB physical) together with larger TILE_E for big graphs.
_VMEM_LIMIT = 48 * 1024 * 1024


# ----------------------------------------------------------------------------
# helpers
# ----------------------------------------------------------------------------
def _round_up(x, m):
    return ((x + m - 1) // m) * m


def _pad_axis(x, axis, target):
    pad = target - x.shape[axis]
    if pad <= 0:
        return x
    widths = [(0, 0)] * x.ndim
    widths[axis] = (0, pad)
    return jnp.pad(x, widths)


def _pad2(x, rows, cols):
    return _pad_axis(_pad_axis(x, 0, rows), 1, cols)


def _resident(shape):
    """BlockSpec for a grid-invariant, fully-resident operand."""
    nd = len(shape)
    return pl.BlockSpec(shape, lambda *args, _n=nd: (0,) * _n)


# ----------------------------------------------------------------------------
# shared in-kernel MLP: 3 x (Linear -> BatchNorm1d(training stats) -> ReLU)
# Requires the FULL row batch to be resident (BN statistics over all rows).
# ----------------------------------------------------------------------------
def _mlp3(h, w1, b1, g1, be1, w2, b2, g2, be2, w3, b3, g3, be3):
    def layer(h_f32, w_r, b_r, g_r, be_r):
        z = jnp.dot(h_f32.astype(jnp.bfloat16), w_r[...],
                    preferred_element_type=jnp.float32) + b_r[...]
        mu = jnp.mean(z, axis=0, keepdims=True)
        var = jnp.mean(jnp.square(z - mu), axis=0, keepdims=True)  # biased, as BN
        zhat = (z - mu) * jax.lax.rsqrt(var + 1e-5)
        return jnp.maximum(zhat * g_r[...] + be_r[...], 0.0)

    h = layer(h, w1, b1, g1, be1)
    h = layer(h, w2, b2, g2, be2)
    h = layer(h, w3, b3, g3, be3)
    return h


# ----------------------------------------------------------------------------
# Kernel A: fused node path
#   gate = sigmoid(cat(xi|xj|attr) @ Wcat + b)     (compact K = 3*D, padded 128)
#   msg  = gate.bf16 * xj.bf16
#   acc += node_inc[:, e_tile] @ msg               (MXU, f32 accumulator)
#   last step: n_pre = acc + (1+eps1)*n_x ; out = node_MLP(n_pre)   (fused)
# Grid reduces over up-edge tiles ("arbitrary"); output block is resident.
# ----------------------------------------------------------------------------
def _node_path_kernel(xcat_ref, xj_ref, inc_ref, wcat_ref, bgate_ref, nx_ref,
                      w1, b1, g1, be1, w2, b2, g2, be2, w3, b3, g3, be3,
                      o_ref, acc_ref, *, eps1):
    e = pl.program_id(0)

    @pl.when(e == 0)
    def _():
        acc_ref[...] = jnp.zeros_like(acc_ref)

    z = jnp.dot(xcat_ref[...], wcat_ref[...],
                preferred_element_type=jnp.float32) + bgate_ref[...]
    gate = jax.nn.sigmoid(z)                                 # f32, EUP slot
    # padded lanes/rows of xj are exactly zero -> msg padded lanes stay zero
    msg = gate.astype(jnp.bfloat16) * xj_ref[...]            # bf16 VPU multiply
    acc_ref[...] += jnp.dot(inc_ref[...], msg,
                            preferred_element_type=jnp.float32)

    @pl.when(e == pl.num_programs(0) - 1)
    def _():
        n_pre = acc_ref[...] + (1.0 + eps1) * nx_ref[...].astype(jnp.float32)
        o_ref[...] = _mlp3(n_pre, w1, b1, g1, be1, w2, b2, g2, be2,
                           w3, b3, g3, be3).astype(o_ref.dtype)


def node_path(xcat_b, xj_b, node_inc_b, wcat_b, bgate, n_x_b, mlp, eps1, tile_e):
    e_pad, k_pad = xcat_b.shape
    bn, d_pad = n_x_b.shape
    h_pad = mlp['w1'].shape[1]
    mlp_args = (mlp['w1'], mlp['b1'], mlp['g1'], mlp['be1'],
                mlp['w2'], mlp['b2'], mlp['g2'], mlp['be2'],
                mlp['w3'], mlp['b3'], mlp['g3'], mlp['be3'])
    kernel = functools.partial(_node_path_kernel, eps1=float(eps1))
    return pl.pallas_call(
        kernel,
        out_shape=jax.ShapeDtypeStruct((bn, h_pad), jnp.float32),
        grid=(e_pad // tile_e,),
        in_specs=[
            pl.BlockSpec((tile_e, k_pad), lambda e: (e, 0)),   # cat(xi|xj|attr)
            pl.BlockSpec((tile_e, d_pad), lambda e: (e, 0)),   # xj (message src)
            pl.BlockSpec((bn, tile_e), lambda e: (0, e)),      # incidence col tile
            _resident(wcat_b.shape),                           # gate weight
            _resident(bgate.shape),                            # gate bias
            _resident(n_x_b.shape),                            # n_x residual (bf16)
        ] + [_resident(a.shape) for a in mlp_args],
        out_specs=_resident((bn, h_pad)),
        scratch_shapes=[pltpu.VMEM((bn, d_pad), jnp.float32)],
        compiler_params=pltpu.CompilerParams(
            dimension_semantics=("arbitrary",),                # reduction axis
            vmem_limit_bytes=_VMEM_LIMIT),
    )(xcat_b, xj_b, node_inc_b, wcat_b, bgate, n_x_b, *mlp_args)


# ----------------------------------------------------------------------------
# Kernel B: fused edge path
#   per-graph block-diagonal aggregation  agg[b] = boundary_adj[b] @ n_x[b]
#   e_pre = agg + (1+eps2)*e_x ; out = edge_MLP(e_pre)   (fused, full batch)
# ----------------------------------------------------------------------------
def _edge_path_kernel(adj_ref, nxg_ref, ex_ref,
                      w1, b1, g1, be1, w2, b2, g2, be2, w3, b3, g3, be3,
                      o_ref, *, num_graphs, eps2):
    aggs = [jnp.dot(adj_ref[b], nxg_ref[b], preferred_element_type=jnp.float32)
            for b in range(num_graphs)]                       # static unroll over B
    agg = jnp.concatenate(aggs, axis=0)                       # (B*NE, Dp) f32
    e_pre = agg + (1.0 + eps2) * ex_ref[...].astype(jnp.float32)
    o_ref[...] = _mlp3(e_pre, w1, b1, g1, be1, w2, b2, g2, be2,
                       w3, b3, g3, be3).astype(o_ref.dtype)


def edge_path(adj_b, nxg_b, e_x_b, mlp, eps2):
    b = adj_b.shape[0]
    rows, _ = e_x_b.shape
    h_pad = mlp['w1'].shape[1]
    mlp_args = (mlp['w1'], mlp['b1'], mlp['g1'], mlp['be1'],
                mlp['w2'], mlp['b2'], mlp['g2'], mlp['be2'],
                mlp['w3'], mlp['b3'], mlp['g3'], mlp['be3'])
    kernel = functools.partial(_edge_path_kernel, num_graphs=b, eps2=float(eps2))
    return pl.pallas_call(
        kernel,
        out_shape=jax.ShapeDtypeStruct((rows, h_pad), jnp.float32),
        grid=(1,),
        in_specs=[_resident(adj_b.shape), _resident(nxg_b.shape),
                  _resident(e_x_b.shape)] + [_resident(a.shape) for a in mlp_args],
        out_specs=_resident((rows, h_pad)),
        compiler_params=pltpu.CompilerParams(
            dimension_semantics=("arbitrary",),
            vmem_limit_bytes=_VMEM_LIMIT),
    )(adj_b, nxg_b, e_x_b, *mlp_args)


# ----------------------------------------------------------------------------
# Parameter construction (deterministic) + lane padding
# ----------------------------------------------------------------------------
def _linear(key, din, dout):
    return jax.random.normal(key, (din, dout), F32) / jnp.sqrt(float(din))


def make_mlp_params(keys, din, hidden):
    dims = [(din, hidden), (hidden, hidden), (hidden, hidden)]
    p = {}
    for li, (a, b) in enumerate(dims, start=1):
        p[f'w{li}'] = _linear(keys[2 * (li - 1)], a, b)
        p[f'b{li}'] = 0.01 * jax.random.normal(keys[2 * (li - 1) + 1], (1, b), F32)
        p[f'g{li}'] = jnp.ones((1, b), F32)     # BN gamma (PyTorch default)
        p[f'be{li}'] = jnp.zeros((1, b), F32)   # BN beta
    return p


def pad_mlp_params(p, din_pad, h_pad):
    q = {'w1': _pad2(p['w1'], din_pad, h_pad).astype(BF16),
         'w2': _pad2(p['w2'], h_pad, h_pad).astype(BF16),
         'w3': _pad2(p['w3'], h_pad, h_pad).astype(BF16)}
    for li in (1, 2, 3):
        q[f'b{li}'] = _pad_axis(p[f'b{li}'], 1, h_pad)
        q[f'g{li}'] = _pad_axis(p[f'g{li}'], 1, h_pad)
        q[f'be{li}'] = _pad_axis(p[f'be{li}'], 1, h_pad)
    return q


def ref_mlp(x, p):
    h = x
    for li in (1, 2, 3):
        z = (jnp.dot(h.astype(BF16), p[f'w{li}'], preferred_element_type=F32)
             + p[f'b{li}'])
        mu = jnp.mean(z, axis=0, keepdims=True)
        var = jnp.mean(jnp.square(z - mu), axis=0, keepdims=True)
        h = jnp.maximum((z - mu) * jax.lax.rsqrt(var + 1e-5) * p[f'g{li}']
                        + p[f'be{li}'], 0.0)
    return h


# ----------------------------------------------------------------------------
# Main: build synthetic cochain data (2 ring graphs) and run the forward pass
# ----------------------------------------------------------------------------
if __name__ == "__main__":
    B, N, NE = 2, 8, 8          # graphs, nodes/graph (ring), edges/graph
    D, H = 32, 32               # layer_dim, hidden
    DP = _round_up(D, LANE)     # lane-dense feature width (128)
    HP = _round_up(H, LANE)
    KP = _round_up(3 * D, LANE)  # compact gate contraction: 96 -> 128

    key = jax.random.PRNGKey(0)
    ks = jax.random.split(key, 20)

    # --- features (logical width D) ---
    n_x = jax.random.normal(ks[0], (B * N, D), F32)
    e_x = jax.random.normal(ks[1], (B * NE, D), F32)

    # --- graph structure: ring, directed up-edges both ways ---
    src = jnp.arange(NE)
    dst = (jnp.arange(NE) + 1) % N
    up_i = jnp.tile(jnp.concatenate([src, dst]), B)
    up_j = jnp.tile(jnp.concatenate([dst, src]), B)
    up_b = jnp.repeat(jnp.arange(B), 2 * NE)
    up_x_i_idx = up_b * N + up_i
    up_x_j_idx = up_b * N + up_j
    E_up = int(up_b.shape[0])

    up_attr = jax.random.normal(ks[2], (E_up, D), F32)

    up_adj = jnp.zeros((B, N, N), F32).at[up_b, up_i, up_j].set(1.0)

    eb = jnp.repeat(jnp.arange(B), NE)
    ee = jnp.tile(jnp.arange(NE), B)
    boundary_adj = (jnp.zeros((B, NE, N), F32)
                    .at[eb, ee, jnp.tile(src, B)].set(1.0)
                    .at[eb, ee, jnp.tile(dst, B)].set(1.0))

    # node incidence: node_inc[b*N+i, e] = sb_weight(up_adj)[b, i_e, j_e]
    # NOTE: .set() -> duplicate (b,i,j) up-edges would overwrite rather than
    # accumulate (matches original dense scatter only for unique triplets).
    node_inc = (jnp.zeros((B * N, E_up), F32)
                .at[up_b * N + up_i, jnp.arange(E_up)]
                .set(up_adj[up_b, up_i, up_j]))

    # --- gate parameters (compact K): Wcat = [wf_i; wf_j; wf_a] at logical D ---
    wf_i = _linear(ks[3], D, D)
    wf_j = _linear(ks[4], D, D)
    wf_a = _linear(ks[5], D, D)
    bgate = 0.01 * jax.random.normal(ks[6], (1, D), F32)
    wcat_b = _pad2(jnp.concatenate([wf_i, wf_j, wf_a], axis=0), KP, DP).astype(BF16)
    bgate_p = _pad_axis(bgate, 1, DP)

    node_mlp = pad_mlp_params(make_mlp_params(jax.random.split(ks[7], 6), D, H), DP, HP)
    edge_mlp = pad_mlp_params(make_mlp_params(jax.random.split(ks[8], 6), D, H), DP, HP)
    eps1, eps2 = 0.0, 0.0

    # --- gather endpoints; compact cat(xi|xj|attr) padded once to K=128 ---
    xi32 = n_x[up_x_i_idx]
    xj32 = n_x[up_x_j_idx]
    xcat = _pad_axis(jnp.concatenate([xi32, xj32, up_attr], axis=-1), 1, KP).astype(BF16)
    xj_b = _pad_axis(xj32, 1, DP).astype(BF16)

    # up-edge axis tiling (padded rows/cols contribute exactly 0).
    # Per-generation: raise towards 2048 on v5e/v6e, keep 512-1024 on v7x.
    TILE_E = min(1024, _round_up(E_up, LANE))
    E_pad = _round_up(E_up, TILE_E)
    xcat_b = _pad_axis(xcat, 0, E_pad)
    xj_b = _pad_axis(xj_b, 0, E_pad)
    node_inc_b = _pad_axis(node_inc, 1, E_pad).astype(BF16)

    n_x_b = _pad_axis(n_x, 1, DP).astype(BF16)       # bf16 residual (half DMA)
    e_x_b = _pad_axis(e_x, 1, DP).astype(BF16)
    adj_b = boundary_adj.astype(BF16)                # per-graph block-diag aggregation
    nxg_b = n_x_b.reshape(B, N, DP)

    # --- forward pass (2 fused Pallas kernels) ---
    n_out = node_path(xcat_b, xj_b, node_inc_b, wcat_b, bgate_p, n_x_b,
                      node_mlp, eps1, TILE_E)[:, :H]
    e_out = edge_path(adj_b, nxg_b, e_x_b, edge_mlp, eps2)[:, :H]
    jax.block_until_ready((n_out, e_out))

    # --- pure-JAX reference with identical dtype decisions ---
    z_ref = jnp.dot(xcat_b, wcat_b, preferred_element_type=F32) + bgate_p
    msg_ref = jax.nn.sigmoid(z_ref).astype(BF16) * xj_b
    n_pre_ref = (jnp.dot(node_inc_b, msg_ref, preferred_element_type=F32)
                 + (1.0 + eps1) * n_x_b.astype(F32))
    agg_e_ref = jnp.einsum('bij,bjd->bid', adj_b, nxg_b,
                           preferred_element_type=F32).reshape(B * NE, DP)
    e_pre_ref = agg_e_ref + (1.0 + eps2) * e_x_b.astype(F32)
    n_out_ref = ref_mlp(n_pre_ref, node_mlp)[:, :H]
    e_out_ref = ref_mlp(e_pre_ref, edge_mlp)[:, :H]

    assert n_out.shape == (B * N, H) and e_out.shape == (B * NE, H)
    assert jnp.allclose(n_out, n_out_ref, atol=5e-2, rtol=5e-2)
    assert jnp.allclose(e_out, e_out_ref, atol=5e-2, rtol=5e-2)
    print("KERNEL_OK")
</pallas_src>

<mosaic_0001>
module attributes {stable_mosaic.version = 11 : i64} {
  func.func @_node_path_kernel(%arg0: i32, %arg1: memref<128x128xbf16, #tpu.memory_space<vmem>>, %arg2: memref<128x128xbf16, #tpu.memory_space<vmem>>, %arg3: memref<16x128xbf16, #tpu.memory_space<vmem>>, %arg4: memref<128x128xbf16, #tpu.memory_space<vmem>>, %arg5: memref<1x128xf32, #tpu.memory_space<vmem>>, %arg6: memref<16x128xbf16, #tpu.memory_space<vmem>>, %arg7: memref<128x128xbf16, #tpu.memory_space<vmem>>, %arg8: memref<1x128xf32, #tpu.memory_space<vmem>>, %arg9: memref<1x128xf32, #tpu.memory_space<vmem>>, %arg10: memref<1x128xf32, #tpu.memory_space<vmem>>, %arg11: memref<128x128xbf16, #tpu.memory_space<vmem>>, %arg12: memref<1x128xf32, #tpu.memory_space<vmem>>, %arg13: memref<1x128xf32, #tpu.memory_space<vmem>>, %arg14: memref<1x128xf32, #tpu.memory_space<vmem>>, %arg15: memref<128x128xbf16, #tpu.memory_space<vmem>>, %arg16: memref<1x128xf32, #tpu.memory_space<vmem>>, %arg17: memref<1x128xf32, #tpu.memory_space<vmem>>, %arg18: memref<1x128xf32, #tpu.memory_space<vmem>>, %arg19: memref<16x128xf32, #tpu.memory_space<vmem>>, %arg20: memref<16x128xf32, #tpu.memory_space<vmem>>) attributes {dimension_semantics = [#tpu.dimension_semantics<arbitrary>], iteration_bounds = array<i64: 1>, scalar_prefetch = 0 : i64, scratch_operands = 1 : i64, tpu.core_type = #tpu.core_type<tc>, window_params = [{transform_indices = @transform_0, window_bounds = array<i64: 128, 128>}, {transform_indices = @transform_1, window_bounds = array<i64: 128, 128>}, {transform_indices = @transform_2, window_bounds = array<i64: 16, 128>}, {pipeline_mode = #tpu.pipeline_mode<synchronous>, transform_indices = @transform_3, window_bounds = array<i64: 128, 128>}, {pipeline_mode = #tpu.pipeline_mode<synchronous>, transform_indices = @transform_4, window_bounds = array<i64: 1, 128>}, {pipeline_mode = #tpu.pipeline_mode<synchronous>, transform_indices = @transform_5, window_bounds = array<i64: 16, 128>}, {pipeline_mode = #tpu.pipeline_mode<synchronous>, transform_indices = @transform_6, window_bounds = array<i64: 128, 128>}, {pipeline_mode = #tpu.pipeline_mode<synchronous>, transform_indices = @transform_7, window_bounds = array<i64: 1, 128>}, {pipeline_mode = #tpu.pipeline_mode<synchronous>, transform_indices = @transform_8, window_bounds = array<i64: 1, 128>}, {pipeline_mode = #tpu.pipeline_mode<synchronous>, transform_indices = @transform_9, window_bounds = array<i64: 1, 128>}, {pipeline_mode = #tpu.pipeline_mode<synchronous>, transform_indices = @transform_10, window_bounds = array<i64: 128, 128>}, {pipeline_mode = #tpu.pipeline_mode<synchronous>, transform_indices = @transform_11, window_bounds = array<i64: 1, 128>}, {pipeline_mode = #tpu.pipeline_mode<synchronous>, transform_indices = @transform_12, window_bounds = array<i64: 1, 128>}, {pipeline_mode = #tpu.pipeline_mode<synchronous>, transform_indices = @transform_13, window_bounds = array<i64: 1, 128>}, {pipeline_mode = #tpu.pipeline_mode<synchronous>, transform_indices = @transform_14, window_bounds = array<i64: 128, 128>}, {pipeline_mode = #tpu.pipeline_mode<synchronous>, transform_indices = @transform_15, window_bounds = array<i64: 1, 128>}, {pipeline_mode = #tpu.pipeline_mode<synchronous>, transform_indices = @transform_16, window_bounds = array<i64: 1, 128>}, {pipeline_mode = #tpu.pipeline_mode<synchronous>, transform_indices = @transform_17, window_bounds = array<i64: 1, 128>}, {pipeline_mode = #tpu.pipeline_mode<synchronous>, transform_indices = @transform_18, window_bounds = array<i64: 16, 128>}]} {
    %c0_i32 = arith.constant 0 : i32
    %0 = arith.cmpi eq, %arg0, %c0_i32 : i32
    %1 = arith.extui %0 : i1 to i32
    %c0_i32_0 = arith.constant 0 : i32
    %2 = arith.cmpi ne, %1, %c0_i32_0 : i32
    scf.if %2 {
      %cst_18 = arith.constant 0.000000e+00 : f32
      %25 = vector.broadcast %cst_18 : f32 to vector<16x128xf32>
      %c0_19 = arith.constant 0 : index
      %c0_20 = arith.constant 0 : index
      %26 = vector.load %arg20[%c0_19, %c0_20] : memref<16x128xf32, #tpu.memory_space<vmem>>, vector<16x128xf32>
      tpu.vector_store %arg20[%c0_19, %c0_20], %25 {strides = array<i32>} : memref<16x128xf32, #tpu.memory_space<vmem>>, vector<16x128xf32>,
    } else {
    }
    %c0 = arith.constant 0 : index
    %c0_1 = arith.constant 0 : index
    %3 = vector.load %arg1[%c0, %c0_1] : memref<128x128xbf16, #tpu.memory_space<vmem>>, vector<128x128xbf16>
    %c0_2 = arith.constant 0 : index
    %c0_3 = arith.constant 0 : index
    %4 = vector.load %arg4[%c0_2, %c0_3] : memref<128x128xbf16, #tpu.memory_space<vmem>>, vector<128x128xbf16>
    %cst = arith.constant dense<0.000000e+00> : vector<128x128xf32>
    %5 = tpu.matmul %3, %4, %cst {dimension_numbers = #tpu.dot_dimension_numbers<[1], [0], [0], [1], [0, 0, 1, 1], [], []>} : vector<128x128xbf16>, vector<128x128xbf16>, vector<128x128xf32> -> vector<128x128xf32>
    %c0_4 = arith.constant 0 : index
    %c0_5 = arith.constant 0 : index
    %6 = vector.load %arg5[%c0_4, %c0_5] : memref<1x128xf32, #tpu.memory_space<vmem>>, vector<1x128xf32>
    %7 = vector.broadcast %6 : vector<1x128xf32> to vector<128x128xf32>
    %8 = arith.addf %5, %7 : vector<128x128xf32>
    %9 = arith.negf %8 : vector<128x128xf32>
    %10 = math.exp %9 : vector<128x128xf32>
    %cst_6 = arith.constant 1.000000e+00 : f32
    %11 = vector.broadcast %cst_6 : f32 to vector<128x128xf32>
    %12 = arith.addf %11, %10 : vector<128x128xf32>
    %13 = arith.divf %11, %12 : vector<128x128xf32>
    %14 = arith.truncf %13 : vector<128x128xf32> to vector<128x128xbf16>
    %c0_7 = arith.constant 0 : index
    %c0_8 = arith.constant 0 : index
    %15 = vector.load %arg2[%c0_7, %c0_8] : memref<128x128xbf16, #tpu.memory_space<vmem>>, vector<128x128xbf16>
    %16 = arith.mulf %14, %15 : vector<128x128xbf16>
    %c0_9 = arith.constant 0 : index
    %c0_10 = arith.constant 0 : index
    %17 = vector.load %arg20[%c0_9, %c0_10] : memref<16x128xf32, #tpu.memory_space<vmem>>, vector<16x128xf32>
    %c0_11 = arith.constant 0 : index
    %c0_12 = arith.constant 0 : index
    %18 = vector.load %arg3[%c0_11, %c0_12] : memref<16x128xbf16, #tpu.memory_space<vmem>>, vector<16x128xbf16>
    %cst_13 = arith.constant dense<0.000000e+00> : vector<16x128xf32>
    %19 = tpu.matmul %18, %16, %cst_13 {dimension_numbers = #tpu.dot_dimension_numbers<[1], [0], [0], [1], [0, 0, 1, 1], [], []>} : vector<16x128xbf16>, vector<128x128xbf16>, vector<16x128xf32> -> vector<16x128xf32>
    %20 = arith.addf %17, %19 : vector<16x128xf32>
    %c0_14 = arith.constant 0 : index
    %c0_15 = arith.constant 0 : index
    %21 = vector.load %arg20[%c0_14, %c0_15] : memref<16x128xf32, #tpu.memory_space<vmem>>, vector<16x128xf32>
    tpu.vector_store %arg20[%c0_14, %c0_15], %20 {strides = array<i32>} : memref<16x128xf32, #tpu.memory_space<vmem>>, vector<16x128xf32>,
    %c0_i32_16 = arith.constant 0 : i32
    %22 = arith.cmpi eq, %arg0, %c0_i32_16 : i32
    %23 = arith.extui %22 : i1 to i32
    %c0_i32_17 = arith.constant 0 : i32
    %24 = arith.cmpi ne, %23, %c0_i32_17 : i32
    scf.if %24 {
      %c0_18 = arith.constant 0 : index
      %c0_19 = arith.constant 0 : index
      %25 = vector.load %arg20[%c0_18, %c0_19] : memref<16x128xf32, #tpu.memory_space<vmem>>, vector<16x128xf32>
      %c0_20 = arith.constant 0 : index
      %c0_21 = arith.constant 0 : index
      %26 = vector.load %arg6[%c0_20, %c0_21] : memref<16x128xbf16, #tpu.memory_space<vmem>>, vector<16x128xbf16>
      %27 = arith.extf %26 : vector<16x128xbf16> to vector<16x128xf32>
      %cst_22 = arith.constant 1.000000e+00 : f32
      %28 = vector.broadcast %cst_22 : f32 to vector<16x128xf32>
      %29 = arith.mulf %28, %27 : vector<16x128xf32>
      %30 = arith.addf %25, %29 : vector<16x128xf32>
      %31 = arith.truncf %30 : vector<16x128xf32> to vector<16x128xbf16>
      %c0_23 = arith.constant 0 : index
      %c0_24 = arith.constant 0 : index
      %32 = vector.load %arg7[%c0_23, %c0_24] : memref<128x128xbf16, #tpu.memory_space<vmem>>, vector<128x128xbf16>
      %cst_25 = arith.constant dense<0.000000e+00> : vector<16x128xf32>
      %33 = tpu.matmul %31, %32, %cst_25 {dimension_numbers = #tpu.dot_dimension_numbers<[1], [0], [0], [1], [0, 0, 1, 1], [], []>} : vector<16x128xbf16>, vector<128x128xbf16>, vector<16x128xf32> -> vector<16x128xf32>
      %c0_26 = arith.constant 0 : index
      %c0_27 = arith.constant 0 : index
      %34 = vector.load %arg8[%c0_26, %c0_27] : memref<1x128xf32, #tpu.memory_space<vmem>>, vector<1x128xf32>
      %35 = vector.broadcast %34 : vector<1x128xf32> to vector<16x128xf32>
      %36 = arith.addf %33, %35 : vector<16x128xf32>
      %cst_28 = arith.constant dense<0.000000e+00> : vector<128xf32>
      %37 = vector.multi_reduction <add>, %36, %cst_28 [0] : vector<16x128xf32> to vector<128xf32>
      %38 = vector.shape_cast %37 : vector<128xf32> to vector<1x128xf32>
      %cst_29 = arith.constant 1.600000e+01 : f32
      %39 = vector.broadcast %cst_29 : f32 to vector<1x128xf32>
      %40 = arith.divf %38, %39 : vector<1x128xf32>
      %41 = vector.broadcast %40 : vector<1x128xf32> to vector<16x128xf32>
      %42 = arith.subf %36, %41 : vector<16x128xf32>
      %43 = arith.mulf %42, %42 : vector<16x128xf32>
      %cst_30 = arith.constant dense<0.000000e+00> : vector<128xf32>
      %44 = vector.multi_reduction <add>, %43, %cst_30 [0] : vector<16x128xf32> to vector<128xf32>
      %45 = vector.shape_cast %44 : vector<128xf32> to vector<1x128xf32>
      %cst_31 = arith.constant 1.600000e+01 : f32
      %46 = vector.broadcast %cst_31 : f32 to vector<1x128xf32>
      %47 = arith.divf %45, %46 : vector<1x128xf32>
      %48 = vector.broadcast %40 : vector<1x128xf32> to vector<16x128xf32>
      %49 = arith.subf %36, %48 : vector<16x128xf32>
      %cst_32 = arith.constant 9.99999974E-6 : f32
      %50 = vector.broadcast %cst_32 : f32 to vector<1x128xf32>
      %51 = arith.addf %47, %50 : vector<1x128xf32>
      %52 = math.rsqrt %51 : vector<1x128xf32>
      %53 = vector.broadcast %52 : vector<1x128xf32> to vector<16x128xf32>
      %54 = arith.mulf %49, %53 : vector<16x128xf32>
      %c0_33 = arith.constant 0 : index
      %c0_34 = arith.constant 0 : index
      %55 = vector.load %arg9[%c0_33, %c0_34] : memref<1x128xf32, #tpu.memory_space<vmem>>, vector<1x128xf32>
      %56 = vector.broadcast %55 : vector<1x128xf32> to vector<16x128xf32>
      %57 = arith.mulf %54, %56 : vector<16x128xf32>
      %c0_35 = arith.constant 0 : index
      %c0_36 = arith.constant 0 : index
      %58 = vector.load %arg10[%c0_35, %c0_36] : memref<1x128xf32, #tpu.memory_space<vmem>>, vector<1x128xf32>
      %59 = vector.broadcast %58 : vector<1x128xf32> to vector<16x128xf32>
      %60 = arith.addf %57, %59 : vector<16x128xf32>
      %cst_37 = arith.constant 0.000000e+00 : f32
      %61 = vector.broadcast %cst_37 : f32 to vector<16x128xf32>
      %62 = arith.maximumf %60, %61 : vector<16x128xf32>
      %63 = arith.truncf %62 : vector<16x128xf32> to vector<16x128xbf16>
      %c0_38 = arith.constant 0 : index
      %c0_39 = arith.constant 0 : index
      %64 = vector.load %arg11[%c0_38, %c0_39] : memref<128x128xbf16, #tpu.memory_space<vmem>>, vector<128x128xbf16>
      %cst_40 = arith.constant dense<0.000000e+00> : vector<16x128xf32>
      %65 = tpu.matmul %63, %64, %cst_40 {dimension_numbers = #tpu.dot_dimension_numbers<[1], [0], [0], [1], [0, 0, 1, 1], [], []>} : vector<16x128xbf16>, vector<128x128xbf16>, vector<16x128xf32> -> vector<16x128xf32>
      %c0_41 = arith.constant 0 : index
      %c0_42 = arith.constant 0 : index
      %66 = vector.load %arg12[%c0_41, %c0_42] : memref<1x128xf32, #tpu.memory_space<vmem>>, vector<1x128xf32>
      %67 = vector.broadcast %66 : vector<1x128xf32> to vector<16x128xf32>
      %68 = arith.addf %65, %67 : vector<16x128xf32>
      %cst_43 = arith.constant dense<0.000000e+00> : vector<128xf32>
      %69 = vector.multi_reduction <add>, %68, %cst_43 [0] : vector<16x128xf32> to vector<128xf32>
      %70 = vector.shape_cast %69 : vector<128xf32> to vector<1x128xf32>
      %cst_44 = arith.constant 1.600000e+01 : f32
      %71 = vector.broadcast %cst_44 : f32 to vector<1x128xf32>
      %72 = arith.divf %70, %71 : vector<1x128xf32>
      %73 = vector.broadcast %72 : vector<1x128xf32> to vector<16x128xf32>
      %74 = arith.subf %68, %73 : vector<16x128xf32>
      %75 = arith.mulf %74, %74 : vector<16x128xf32>
      %cst_45 = arith.constant dense<0.000000e+00> : vector<128xf32>
      %76 = vector.multi_reduction <add>, %75, %cst_45 [0] : vector<16x128xf32> to vector<128xf32>
      %77 = vector.shape_cast %76 : vector<128xf32> to vector<1x128xf32>
      %cst_46 = arith.constant 1.600000e+01 : f32
      %78 = vector.broadcast %cst_46 : f32 to vector<1x128xf32>
      %79 = arith.divf %77, %78 : vector<1x128xf32>
      %80 = vector.broadcast %72 : vector<1x128xf32> to vector<16x128xf32>
      %81 = arith.subf %68, %80 : vector<16x128xf32>
      %cst_47 = arith.constant 9.99999974E-6 : f32
      %82 = vector.broadcast %cst_47 : f32 to vector<1x128xf32>
      %83 = arith.addf %79, %82 : vector<1x128xf32>
      %84 = math.rsqrt %83 : vector<1x128xf32>
      %85 = vector.broadcast %84 : vector<1x128xf32> to vector<16x128xf32>
      %86 = arith.mulf %81, %85 : vector<16x128xf32>
      %c0_48 = arith.constant 0 : index
      %c0_49 = arith.constant 0 : index
      %87 = vector.load %arg13[%c0_48, %c0_49] : memref<1x128xf32, #tpu.memory_space<vmem>>, vector<1x128xf32>
      %88 = vector.broadcast %87 : vector<1x128xf32> to vector<16x128xf32>
      %89 = arith.mulf %86, %88 : vector<16x128xf32>
      %c0_50 = arith.constant 0 : index
      %c0_51 = arith.constant 0 : index
      %90 = vector.load %arg14[%c0_50, %c0_51] : memref<1x128xf32, #tpu.memory_space<vmem>>, vector<1x128xf32>
      %91 = vector.broadcast %90 : vector<1x128xf32> to vector<16x128xf32>
      %92 = arith.addf %89, %91 : vector<16x128xf32>
      %cst_52 = arith.constant 0.000000e+00 : f32
      %93 = vector.broadcast %cst_52 : f32 to vector<16x128xf32>
      %94 = arith.maximumf %92, %93 : vector<16x128xf32>
      %95 = arith.truncf %94 : vector<16x128xf32> to vector<16x128xbf16>
      %c0_53 = arith.constant 0 : index
      %c0_54 = arith.constant 0 : index
      %96 = vector.load %arg15[%c0_53, %c0_54] : memref<128x128xbf16, #tpu.memory_space<vmem>>, vector<128x128xbf16>
      %cst_55 = arith.constant dense<0.000000e+00> : vector<16x128xf32>
      %97 = tpu.matmul %95, %96, %cst_55 {dimension_numbers = #tpu.dot_dimension_numbers<[1], [0], [0], [1], [0, 0, 1, 1], [], []>} : vector<16x128xbf16>, vector<128x128xbf16>, vector<16x128xf32> -> vector<16x128xf32>
      %c0_56 = arith.constant 0 : index
      %c0_57 = arith.constant 0 : index
      %98 = vector.load %arg16[%c0_56, %c0_57] : memref<1x128xf32, #tpu.memory_space<vmem>>, vector<1x128xf32>
      %99 = vector.broadcast %98 : vector<1x128xf32> to vector<16x128xf32>
      %100 = arith.addf %97, %99 : vector<16x128xf32>
      %cst_58 = arith.constant dense<0.000000e+00> : vector<128xf32>
      %101 = vector.multi_reduction <add>, %100, %cst_58 [0] : vector<16x128xf32> to vector<128xf32>
      %102 = vector.shape_cast %101 : vector<128xf32> to vector<1x128xf32>
      %cst_59 = arith.constant 1.600000e+01 : f32
      %103 = vector.broadcast %cst_59 : f32 to vector<1x128xf32>
      %104 = arith.divf %102, %103 : vector<1x128xf32>
      %105 = vector.broadcast %104 : vector<1x128xf32> to vector<16x128xf32>
      %106 = arith.subf %100, %105 : vector<16x128xf32>
      %107 = arith.mulf %106, %106 : vector<16x128xf32>
      %cst_60 = arith.constant dense<0.000000e+00> : vector<128xf32>
      %108 = vector.multi_reduction <add>, %107, %cst_60 [0] : vector<16x128xf32> to vector<128xf32>
      %109 = vector.shape_cast %108 : vector<128xf32> to vector<1x128xf32>
      %cst_61 = arith.constant 1.600000e+01 : f32
      %110 = vector.broadcast %cst_61 : f32 to vector<1x128xf32>
      %111 = arith.divf %109, %110 : vector<1x128xf32>
      %112 = vector.broadcast %104 : vector<1x128xf32> to vector<16x128xf32>
      %113 = arith.subf %100, %112 : vector<16x128xf32>
      %cst_62 = arith.constant 9.99999974E-6 : f32
      %114 = vector.broadcast %cst_62 : f32 to vector<1x128xf32>
      %115 = arith.addf %111, %114 : vector<1x128xf32>
      %116 = math.rsqrt %115 : vector<1x128xf32>
      %117 = vector.broadcast %116 : vector<1x128xf32> to vector<16x128xf32>
      %118 = arith.mulf %113, %117 : vector<16x128xf32>
      %c0_63 = arith.constant 0 : index
      %c0_64 = arith.constant 0 : index
      %119 = vector.load %arg17[%c0_63, %c0_64] : memref<1x128xf32, #tpu.memory_space<vmem>>, vector<1x128xf32>
      %120 = vector.broadcast %119 : vector<1x128xf32> to vector<16x128xf32>
      %121 = arith.mulf %118, %120 : vector<16x128xf32>
      %c0_65 = arith.constant 0 : index
      %c0_66 = arith.constant 0 : index
      %122 = vector.load %arg18[%c0_65, %c0_66] : memref<1x128xf32, #tpu.memory_space<vmem>>, vector<1x128xf32>
      %123 = vector.broadcast %122 : vector<1x128xf32> to vector<16x128xf32>
      %124 = arith.addf %121, %123 : vector<16x128xf32>
      %cst_67 = arith.constant 0.000000e+00 : f32
      %125 = vector.broadcast %cst_67 : f32 to vector<16x128xf32>
      %126 = arith.maximumf %124, %125 : vector<16x128xf32>
      %c0_68 = arith.constant 0 : index
      %c0_69 = arith.constant 0 : index
      %127 = vector.load %arg19[%c0_68, %c0_69] : memref<16x128xf32, #tpu.memory_space<vmem>>, vector<16x128xf32>
      tpu.vector_store %arg19[%c0_68, %c0_69], %126 {strides = array<i32>} : memref<16x128xf32, #tpu.memory_space<vmem>>, vector<16x128xf32>,
    } else {
    }
    return
  }
  func.func @transform_0(%arg0: i32) -> (i32, i32) {
    %c0_i32 = arith.constant 0 : i32
    %c0_i32_0 = arith.constant 0 : i32
    return %arg0, %c0_i32 : i32, i32
  }
  func.func @transform_1(%arg0: i32) -> (i32, i32) {
    %c0_i32 = arith.constant 0 : i32
    %c0_i32_0 = arith.constant 0 : i32
    return %arg0, %c0_i32 : i32, i32
  }
  func.func @transform_2(%arg0: i32) -> (i32, i32) {
    %c0_i32 = arith.constant 0 : i32
    %c0_i32_0 = arith.constant 0 : i32
    return %c0_i32, %arg0 : i32, i32
  }
  func.func @transform_3(%arg0: i32) -> (i32, i32) {
    %c0_i32 = arith.constant 0 : i32
    %c0_i32_0 = arith.constant 0 : i32
    %c0_i32_1 = arith.constant 0 : i32
    return %c0_i32, %c0_i32_0 : i32, i32
  }
  func.func @transform_4(%arg0: i32) -> (i32, i32) {
    %c0_i32 = arith.constant 0 : i32
    %c0_i32_0 = arith.constant 0 : i32
    %c0_i32_1 = arith.constant 0 : i32
    return %c0_i32, %c0_i32_0 : i32, i32
  }
  func.func @transform_5(%arg0: i32) -> (i32, i32) {
    %c0_i32 = arith.constant 0 : i32
    %c0_i32_0 = arith.constant 0 : i32
    %c0_i32_1 = arith.constant 0 : i32
    return %c0_i32, %c0_i32_0 : i32, i32
  }
  func.func @transform_6(%arg0: i32) -> (i32, i32) {
    %c0_i32 = arith.constant 0 : i32
    %c0_i32_0 = arith.constant 0 : i32
    %c0_i32_1 = arith.constant 0 : i32
    return %c0_i32, %c0_i32_0 : i32, i32
  }
  func.func @transform_7(%arg0: i32) -> (i32, i32) {
    %c0_i32 = arith.constant 0 : i32
    %c0_i32_0 = arith.constant 0 : i32
    %c0_i32_1 = arith.constant 0 : i32
    return %c0_i32, %c0_i32_0 : i32, i32
  }
  func.func @transform_8(%arg0: i32) -> (i32, i32) {
    %c0_i32 = arith.constant 0 : i32
    %c0_i32_0 = arith.constant 0 : i32
    %c0_i32_1 = arith.constant 0 : i32
    return %c0_i32, %c0_i32_0 : i32, i32
  }
  func.func @transform_9(%arg0: i32) -> (i32, i32) {
    %c0_i32 = arith.constant 0 : i32
    %c0_i32_0 = arith.constant 0 : i32
    %c0_i32_1 = arith.constant 0 : i32
    return %c0_i32, %c0_i32_0 : i32, i32
  }
  func.func @transform_10(%arg0: i32) -> (i32, i32) {
    %c0_i32 = arith.constant 0 : i32
    %c0_i32_0 = arith.constant 0 : i32
    %c0_i32_1 = arith.constant 0 : i32
    return %c0_i32, %c0_i32_0 : i32, i32
  }
  func.func @transform_11(%arg0: i32) -> (i32, i32) {
    %c0_i32 = arith.constant 0 : i32
    %c0_i32_0 = arith.constant 0 : i32
    %c0_i32_1 = arith.constant 0 : i32
    return %c0_i32, %c0_i32_0 : i32, i32
  }
  func.func @transform_12(%arg0: i32) -> (i32, i32) {
    %c0_i32 = arith.constant 0 : i32
    %c0_i32_0 = arith.constant 0 : i32
    %c0_i32_1 = arith.constant 0 : i32
    return %c0_i32, %c0_i32_0 : i32, i32
  }
  func.func @transform_13(%arg0: i32) -> (i32, i32) {
    %c0_i32 = arith.constant 0 : i32
    %c0_i32_0 = arith.constant 0 : i32
    %c0_i32_1 = arith.constant 0 : i32
    return %c0_i32, %c0_i32_0 : i32, i32
  }
  func.func @transform_14(%arg0: i32) -> (i32, i32) {
    %c0_i32 = arith.constant 0 : i32
    %c0_i32_0 = arith.constant 0 : i32
    %c0_i32_1 = arith.constant 0 : i32
    return %c0_i32, %c0_i32_0 : i32, i32
  }
  func.func @transform_15(%arg0: i32) -> (i32, i32) {
    %c0_i32 = arith.constant 0 : i32
    %c0_i32_0 = arith.constant 0 : i32
    %c0_i32_1 = arith.constant 0 : i32
    return %c0_i32, %c0_i32_0 : i32, i32
  }
  func.func @transform_16(%arg0: i32) -> (i32, i32) {
    %c0_i32 = arith.constant 0 : i32
    %c0_i32_0 = arith.constant 0 : i32
    %c0_i32_1 = arith.constant 0 : i32
    return %c0_i32, %c0_i32_0 : i32, i32
  }
  func.func @transform_17(%arg0: i32) -> (i32, i32) {
    %c0_i32 = arith.constant 0 : i32
    %c0_i32_0 = arith.constant 0 : i32
    %c0_i32_1 = arith.constant 0 : i32
    return %c0_i32, %c0_i32_0 : i32, i32
  }
  func.func @transform_18(%arg0: i32) -> (i32, i32) {
    %c0_i32 = arith.constant 0 : i32
    %c0_i32_0 = arith.constant 0 : i32
    %c0_i32_1 = arith.constant 0 : i32
    return %c0_i32, %c0_i32_0 : i32, i32
  }
}

</mosaic_0001>

<bundles_post_ra>
// kernel: tpu_custom_call.1
= control target key start
LH: loop header
LB: loop body
LE: loop exit
PB: predicated region body
PF: predicated region fallthrough
CT: control target
= control target key end

     0   :  { %s2030_s0 = inlined_call_operand.hbm [shape: bf16[128,128], index: 0, kind: input, shape index: {}]   ;;  %s2031_s1 = inlined_call_operand.hbm [shape: bf16[128,128], index: 1, kind: input, shape index: {}]   ;;  %s2032_s2 = inlined_call_operand.hbm [shape: bf16[16,128], index: 2, kind: input, shape index: {}]   ;;  %s2033_s3 = inlined_call_operand.hbm [shape: bf16[128,128], index: 3, kind: input, shape index: {}]   ;;  %s2034_s4 = inlined_call_operand.vmem [shape: f32[1,128], index: 4, kind: input, shape index: {}]   ;;  %s2035_s5 = inlined_call_operand.vmem [shape: bf16[16,128], index: 5, kind: input, shape index: {}]   ;;  %s2036_s6 = inlined_call_operand.hbm [shape: bf16[128,128], index: 6, kind: input, shape index: {}]   ;;  %s2037_s7 = inlined_call_operand.vmem [shape: f32[1,128], index: 7, kind: input, shape index: {}]   ;;  %s2038_s8 = inlined_call_operand.vmem [shape: f32[1,128], index: 8, kind: input, shape index: {}]   ;;  %s2039_s9 = inlined_call_operand.vmem [shape: f32[1,128], index: 9, kind: input, shape index: {}]   ;;  %s2040_s10 = inlined_call_operand.hbm [shape: bf16[128,128], index: 10, kind: input, shape index: {}]   ;;  %s2041_s11 = inlined_call_operand.vmem [shape: f32[1,128], index: 11, kind: input, shape index: {}]   ;;  %s2042_s12 = inlined_call_operand.vmem [shape: f32[1,128], index: 12, kind: input, shape index: {}]   ;;  %s2043_s13 = inlined_call_operand.vmem [shape: f32[1,128], index: 13, kind: input, shape index: {}]   ;;  %s2044_s14 = inlined_call_operand.hbm [shape: bf16[128,128], index: 14, kind: input, shape index: {}]   ;;  %s2045_s15 = inlined_call_operand.vmem [shape: f32[1,128], index: 15, kind: input, shape index: {}]   ;;  %s2046_s16 = inlined_call_operand.vmem [shape: f32[1,128], index: 16, kind: input, shape index: {}]   ;;  %s2047_s17 = inlined_call_operand.vmem [shape: f32[1,128], index: 17, kind: input, shape index: {}]   ;;  %s2048_s18 = inlined_call_operand.hbm [shape: f32[16,128], index: 18, kind: output, shape index: {}]  }
   0x1   :  { %2053 = sst [smem:[#allocation21_spill]] %s2030_s0 }
   0x2   :  { %2054 = sst [smem:[#allocation22_spill]] %s2031_s1 }
   0x3   :  { %2055 = sst [smem:[#allocation23_spill]] %s2032_s2 }
   0x4   :  { %2056 = sst [smem:[#allocation24_spill]] %s2048_s18 }
   0x5   :  { %23 = vsyncpa [#allocation4], 0 }
   0x6   :  { %24 = vsyncpa [#allocation7], 0 }
   0x7   :  { %25 = vsyncpa [#allocation10], 0 }
   0x8   :  { %26 = vsyncpa [#allocation13], 0 }
   0x9   :  { %27 = vsyncpa [#allocation5], 0  ;;  %s1692_s27 = smov [#allocation6]   ;;  %s1693_s29 = smov [#allocation9]  }
   0xa   :  { %s45_s28 = sshll.u32 %s1692_s27, 4  ;;  %s69_s30 = sshll.u32 %s1693_s29, 4  ;;  %s46_s28 = int_to_ptr.vmem [resolvable:$true] %s45_s28  ;;  %s1801_s30 = int_to_ptr.vmem [resolvable:$true] %s69_s30 }
   0xb   :  { %s2057_s1 = sld [smem:[#allocation22_spill]] }
  0x11   :  { %s1506_s20 = scalar_lea.hbm %s2057_s1, 1024 }
  0x12   :  { %p1507_p0 = scmp.ne.s32.totalorder %s2057_s1, %s1506_s20  ;;  %p1510_p1 = scmp.lt.u32.totalorder %s1506_s20, %s2057_s1 }
  0x14   :  { %p1512_p2 = pnand %p1510_p1, %p1507_p0 }
  0x16   :  { %1515 = shalt.err (!%p1512_p2)
}
  0x17   :  { %s1516_s24 = scalar_lea.vmem %s46_s28, 1024  ;;  %p1521_p4 = scmp.lt.s32.totalorder %s46_s28, %s46_s28 }
  0x18   :  { %p1517_p3 = scmp.ne.s32.totalorder %s46_s28, %s1516_s24  ;;  %p1522_p5 = scmp.lt.s32.totalorder %s1516_s24, %s1516_s24 }
  0x1a   :  { %p1523_p6 = por %p1522_p5, %p1521_p4 }
  0x1c   :  { %p1524_p7 = pnand %p1523_p6, %p1517_p3 }
  0x1e   :  { %1527 = shalt.err (!%p1524_p7)
}
  0x1f   :  { %s1694_s25 = smov 64   ;;  %s1695_s26 = smov 4  }
  0x20   :  { %51 = dma.hbm_to_vmem [thread:$0]  %s2057_s1, 1024, %s46_s28, [#allocation7], %s1694_s25, %s1694_s25, %s1695_s26  }
  0x21   :  { %s1528_s20 = scalar_lea.hbm %s2033_s3, 1024 }
  0x22   :  { %p1529_p8 = scmp.ne.s32.totalorder %s2033_s3, %s1528_s20  ;;  %p1532_p9 = scmp.lt.u32.totalorder %s1528_s20, %s2033_s3 }
  0x24   :  { %p1534_p10 = pnand %p1532_p9, %p1529_p8 }
  0x26   :  { %1537 = shalt.err (!%p1534_p10)
}
  0x27   :  { %s1538_s24 = scalar_lea.vmem %s1801_s30, 1024  ;;  %p1543_p12 = scmp.lt.s32.totalorder %s1801_s30, %s1801_s30 }
  0x28   :  { %p1539_p11 = scmp.ne.s32.totalorder %s1801_s30, %s1538_s24  ;;  %p1544_p13 = scmp.lt.s32.totalorder %s1538_s24, %s1538_s24 }
  0x2a   :  { %p1545_p0 = por %p1544_p13, %p1543_p12 }
  0x2c   :  { %p1546_p1 = pnand %p1545_p0, %p1539_p11 }
  0x2e   :  { %1549 = shalt.err (!%p1546_p1)
}
  0x2f   :  { %75 = dma.hbm_to_vmem [thread:$0]  %s2033_s3, 1024, %s1801_s30, [#allocation10], %s1694_s25, %s1694_s25, %s1695_s26  }
  0x30   :  { %s1696_s27 = smov [#allocation12]   ;;  %s1697_s0 = smov [#allocation3]  }
  0x31   :  { %s103_s29 = sshll.u32 %s1696_s27, 4  ;;  %s33_s19 = sshll.u32 %s1697_s0, 4  ;;  %s104_s29 = int_to_ptr.vmem [resolvable:$true] %s103_s29  ;;  %s1838_s19 = int_to_ptr.vmem [resolvable:$true] %s33_s19 }
  0x32   :  { %s1550_s22 = scalar_lea.hbm %s2040_s10, 1024 }
  0x33   :  { %p1551_p2 = scmp.ne.s32.totalorder %s2040_s10, %s1550_s22  ;;  %p1554_p3 = scmp.lt.u32.totalorder %s1550_s22, %s2040_s10 }
  0x35   :  { %p1556_p4 = pnand %p1554_p3, %p1551_p2 }
  0x37   :  { %1559 = shalt.err (!%p1556_p4)
}
  0x38   :  { %s1560_s3 = scalar_lea.vmem %s104_s29, 1024  ;;  %p1565_p6 = scmp.lt.s32.totalorder %s104_s29, %s104_s29 }
  0x39   :  { %p1561_p5 = scmp.ne.s32.totalorder %s104_s29, %s1560_s3  ;;  %p1566_p7 = scmp.lt.s32.totalorder %s1560_s3, %s1560_s3 }
  0x3b   :  { %p1567_p8 = por %p1566_p7, %p1565_p6 }
  0x3d   :  { %p1568_p9 = pnand %p1567_p8, %p1561_p5 }
  0x3f   :  { %1571 = shalt.err (!%p1568_p9)
}
  0x40   :  { %109 = dma.hbm_to_vmem [thread:$0]  %s2040_s10, 1024, %s104_s29, [#allocation13], %s1694_s25, %s1694_s25, %s1695_s26  }
  0x41   :  { %s2058_s18 = sld [smem:[#allocation21_spill]] }
  0x47   :  { %s1572_s0 = scalar_lea.hbm %s2058_s18, 1024 }
  0x48   :  { %p1573_p10 = scmp.ne.s32.totalorder %s2058_s18, %s1572_s0  ;;  %p1576_p11 = scmp.lt.u32.totalorder %s1572_s0, %s2058_s18 }
  0x4a   :  { %p1578_p12 = pnand %p1576_p11, %p1573_p10 }
  0x4c   :  { %1581 = shalt.err (!%p1578_p12)
}
  0x4d   :  { %s1582_s23 = scalar_lea.vmem %s1838_s19, 1024  ;;  %p1587_p0 = scmp.lt.s32.totalorder %s1838_s19, %s1838_s19 }
  0x4e   :  { %p1583_p13 = scmp.ne.s32.totalorder %s1838_s19, %s1582_s23  ;;  %p1588_p1 = scmp.lt.s32.totalorder %s1582_s23, %s1582_s23 }
  0x50   :  { %p1589_p2 = por %p1588_p1, %p1587_p0 }
  0x52   :  { %p1590_p3 = pnand %p1589_p2, %p1583_p13 }
  0x54   :  { %1593 = shalt.err (!%p1590_p3)
}
  0x55   :  { %39 = dma.hbm_to_vmem [thread:$0]  %s2058_s18, 1024, %s1838_s19, [#allocation4], %s1694_s25, %s1694_s25, %s1695_s26  }
  0x56   :  { %s1698_s24 = smov [#allocation8]   ;;  %s1699_s30 = smov [#allocation11]  }
  0x57   :  { %s57_s3 = sshll.u32 %s1698_s24, 4  ;;  %s85_s28 = sshll.u32 %s1699_s30, 4  ;;  %s58_s3 = int_to_ptr.vmem [resolvable:$true] %s57_s3  ;;  %s1875_s28 = int_to_ptr.vmem [resolvable:$true] %s85_s28 }
  0x58   :  { %s2059_s0 = sld [smem:[#allocation23_spill]] }
  0x5e   :  { %s1594_s20 = scalar_lea.hbm %s2059_s0, 128 }
  0x5f   :  { %p1595_p4 = scmp.ne.s32.totalorder %s2059_s0, %s1594_s20  ;;  %p1598_p5 = scmp.lt.u32.totalorder %s1594_s20, %s2059_s0 }
  0x61   :  { %p1600_p6 = pnand %p1598_p5, %p1595_p4 }
  0x63   :  { %1603 = shalt.err (!%p1600_p6)
}
  0x64   :  { %s1604_s19 = scalar_lea.vmem %s58_s3, 128  ;;  %p1609_p8 = scmp.lt.s32.totalorder %s58_s3, %s58_s3 }
  0x65   :  { %p1605_p7 = scmp.ne.s32.totalorder %s58_s3, %s1604_s19  ;;  %p1610_p9 = scmp.lt.s32.totalorder %s1604_s19, %s1604_s19 }
  0x67   :  { %p1611_p10 = por %p1610_p9, %p1609_p8 }
  0x69   :  { %p1612_p11 = pnand %p1611_p10, %p1605_p7 }
  0x6b   :  { %1615 = shalt.err (!%p1612_p11)
}
  0x6c   :  { %63 = dma.hbm_to_vmem [thread:$0]  %s2059_s0, 128, %s58_s3, [#allocation7], %s1694_s25, %s1694_s25, %s1695_s26  }
  0x6d   :  { %s1616_s30 = scalar_lea.hbm %s2036_s6, 1024 }
  0x6e   :  { %p1617_p12 = scmp.ne.s32.totalorder %s2036_s6, %s1616_s30  ;;  %p1620_p13 = scmp.lt.u32.totalorder %s1616_s30, %s2036_s6 }
  0x70   :  { %p1622_p0 = pnand %p1620_p13, %p1617_p12 }
  0x72   :  { %1625 = shalt.err (!%p1622_p0)
}
  0x73   :  { %s1626_s22 = scalar_lea.vmem %s1875_s28, 1024  ;;  %p1631_p2 = scmp.lt.s32.totalorder %s1875_s28, %s1875_s28 }
  0x74   :  { %p1627_p1 = scmp.ne.s32.totalorder %s1875_s28, %s1626_s22  ;;  %p1632_p3 = scmp.lt.s32.totalorder %s1626_s22, %s1626_s22 }
  0x76   :  { %p1633_p4 = por %p1632_p3, %p1631_p2 }
  0x78   :  { %p1634_p5 = pnand %p1633_p4, %p1627_p1 }
  0x7a   :  { %1637 = shalt.err (!%p1634_p5)
}
  0x7b   :  { %91 = dma.hbm_to_vmem [thread:$0]  %s2036_s6, 1024, %s1875_s28, [#allocation10], %s1694_s25, %s1694_s25, %s1695_s26  }
  0x7c   :  { %s1700_s2 = smov [#allocation14]   ;;  %s1638_s10 = scalar_lea.hbm %s2044_s14, 1024 }
  0x7d   :  { %s121_s23 = sshll.u32 %s1700_s2, 4  ;;  %p1639_p6 = scmp.ne.s32.totalorder %s2044_s14, %s1638_s10  ;;  %s122_s23 = int_to_ptr.vmem [resolvable:$true] %s121_s23 }
  0x7e   :  { %p1642_p7 = scmp.lt.u32.totalorder %s1638_s10, %s2044_s14 }
  0x80   :  { %p1644_p8 = pnand %p1642_p7, %p1639_p6 }
  0x82   :  { %1647 = shalt.err (!%p1644_p8)
}
  0x83   :  { %s1648_s27 = scalar_lea.vmem %s122_s23, 1024  ;;  %p1653_p10 = scmp.lt.s32.totalorder %s122_s23, %s122_s23 }
  0x84   :  { %p1649_p9 = scmp.ne.s32.totalorder %s122_s23, %s1648_s27  ;;  %p1654_p11 = scmp.lt.s32.totalorder %s1648_s27, %s1648_s27 }
  0x86   :  { %p1655_p12 = por %p1654_p11, %p1653_p10 }
  0x88   :  { %p1656_p13 = pnand %p1655_p12, %p1649_p9 }
  0x8a   :  { %1659 = shalt.err (!%p1656_p13)
}
  0x8b   :  { %127 = dma.hbm_to_vmem [thread:$0]  %s2044_s14, 1024, %s122_s23, [#allocation13], %s1694_s25, %s1694_s25, %s1695_s26  }
  0x8c   :  { %1682 = dma.done.wait [#allocation4], 1024  }
  0x8d   :  { %1683 = vsyncadd [#allocation4], 4294966272 }
  0x8e   :  { %1684 = dma.done.wait [#allocation7], 1152  }
  0x8f   :  { %1685 = vsyncadd [#allocation7], 4294966144 }
  0x90   :  { %1686 = dma.done.wait [#allocation10], 2048  }
  0x91   :  { %1687 = vsyncadd [#allocation10], 4294965248 }
  0x92   :  { %1688 = dma.done.wait [#allocation13], 2048  }
  0x93   :  { %1689 = vsyncadd [#allocation13], 4294965248  ;;  %v1387_v0 = vld [vmem:[#allocation9] sm:$0xff]   ;;  %v1388_v1 = vld [vmem:[#allocation9 + $0x8] sm:$0xff]   ;;  %v1701_v16 = vmov 0.0   ;;  %vm1702_vm0 = vmmov 0  }
  0x94   :  { %1261 = vmatprep.subr.bf16.mxu0 %v1387_v0  ;;  %v1389_v2 = vld [vmem:[#allocation9 + $0x10] sm:$0xff]   ;;  %v1390_v3 = vld [vmem:[#allocation9 + $0x18] sm:$0xff]   ;;  %v1391_v5 = vld [vmem:[#allocation9 + $0x20] sm:$0xff]   ;;  %1293 = vmatprep.subr.bf16.mxu1 %v1701_v16  ;;  %s1703_s29 = smov [#allocation15]  }
  0x95   :  { %1262 = vmatpush3.bf16.msra.mxu0 %v1387_v0  ;;  %v1395_v4 = vld [vmem:[#allocation3] sm:$0xff]   ;;  %v1392_v6 = vld [vmem:[#allocation9 + $0x28] sm:$0xff]   ;;  %v1393_v7 = vld [vmem:[#allocation9 + $0x30] sm:$0xff]   ;;  %1309 = vmatprep.mubr.msk.bf16.mxu1 %vm1702_vm0, %v1701_v16  ;;  %s1115_s24 = sshll.u32 %s1703_s29, 4  ;;  %s1116_s24 = int_to_ptr.vmem [resolvable:$true] %s1115_s24 }
  0x96   :  { %1263 = vmatprep.subr.bf16.mxu0 %v1388_v1  ;;  %1277 = vmatprep.mubr.bf16.mxu0 %v1395_v4  ;;  %v1394_v8 = vld [vmem:[#allocation9 + $0x38] sm:$0xff]   ;;  %v1396_v9 = vld [vmem:[#allocation3 + $0x8] sm:$0xff]   ;;  %v1397_v10 = vld [vmem:[#allocation3 + $0x10] sm:$0xff]   ;;  %s1660_s30 = scalar_lea.vmem %s1116_s24, 256  ;;  %p1665_p1 = scmp.lt.s32.totalorder %s1116_s24, %s1116_s24 }
  0x97   :  { %v1398_v11 = vld [vmem:[#allocation3 + $0x18] sm:$0xff]   ;;  %v1399_v12 = vld [vmem:[#allocation3 + $0x20] sm:$0xff]   ;;  %v1400_v13 = vld [vmem:[#allocation3 + $0x28] sm:$0xff]   ;;  %p1661_p0 = scmp.ne.s32.totalorder %s1116_s24, %s1660_s30  ;;  %p1666_p2 = scmp.lt.s32.totalorder %s1660_s30, %s1660_s30 }
  0x98   :  { %v1401_v14 = vld [vmem:[#allocation3 + $0x30] sm:$0xff]   ;;  %v1402_v15 = vld [vmem:[#allocation3 + $0x38] sm:$0xff]   ;;  %v1412_v17 = vld [vmem:[#allocation11] sm:$0xff]  }
  0x99   :  { %1264 = vmatpush3.bf16.msra.mxu0 %v1388_v1  ;;  %v1413_v18 = vld [vmem:[#allocation11 + $0x8] sm:$0xff]   ;;  %v1414_v19 = vld [vmem:[#allocation11 + $0x10] sm:$0xff]   ;;  %v1415_v20 = vld [vmem:[#allocation11 + $0x18] sm:$0xff]   ;;  %p1667_p3 = por %p1666_p2, %p1665_p1 }
  0x9a   :  { %1265 = vmatprep.subr.bf16.mxu0 %v1389_v2  ;;  %v1416_v21 = vld [vmem:[#allocation11 + $0x20] sm:$0xff]   ;;  %v1417_v22 = vld [vmem:[#allocation11 + $0x28] sm:$0xff]   ;;  %v1418_v23 = vld [vmem:[#allocation11 + $0x30] sm:$0xff]  }
  0x9b   :  { %v1943_v24 = vld [vmem:[%s2034_s4] ss:$0 sm:$0xff]  ;;  %p1668_p4 = pnand %p1667_p3, %p1661_p0 }
  0x9d   :  { %1266 = vmatpush3.bf16.msra.mxu0 %v1389_v2 }
  0x9e   :  { %1267 = vmatprep.subr.bf16.mxu0 %v1390_v3 }
  0xa1   :  { %1268 = vmatpush3.bf16.msra.mxu0 %v1390_v3 }
  0xa2   :  { %1269 = vmatprep.subr.bf16.mxu0 %v1391_v5 }
  0xa5   :  { %1270 = vmatpush3.bf16.msra.mxu0 %v1391_v5 }
  0xa6   :  { %1271 = vmatprep.subr.bf16.mxu0 %v1392_v6 }
  0xa9   :  { %1272 = vmatpush3.bf16.msra.mxu0 %v1392_v6 }
  0xaa   :  { %1273 = vmatprep.subr.bf16.mxu0 %v1393_v7 }
  0xad   :  { %1274 = vmatpush3.bf16.msra.mxu0 %v1393_v7 }
  0xae   :  { %1275 = vmatprep.subr.bf16.mxu0 %v1394_v8 }
  0xb1   :  { %1276 = vmatpush3.bf16.msra.mxu0 %v1394_v8 }
  0xb2   :  { %1313 = vmatprep.subr.bf16.mxu0 %v1701_v16 }
  0xb4   :  { %1278 = vmatmul.mubr.bf16.vlgmr.msra.gmra.mrb[0].mxu0 %v1396_v9 }
  0xb5   :  { %1281 = vmatprep.mubr.bf16.mxu0 %v1397_v10  ;;  %1314 = vmatpush3.bf16.msra.mxu0 %v1412_v17 }
  0xb6   :  { %1315 = vmatprep.subr.bf16.mxu0 %v1701_v16 }
  0xb9   :  { %1316 = vmatpush3.bf16.msra.mxu0 %v1413_v18 }
  0xba   :  { %1317 = vmatprep.subr.bf16.mxu0 %v1701_v16 }
  0xbc   :  { %1282 = vmatmul.mubr.bf16.gmra.mrb[4].mxu0 %v1398_v11 }
  0xbd   :  { %1285 = vmatprep.mubr.bf16.mxu0 %v1399_v12  ;;  %1318 = vmatpush3.bf16.msra.mxu0 %v1414_v19 }
  0xbe   :  { %1319 = vmatprep.subr.bf16.mxu0 %v1701_v16 }
  0xc1   :  { %1320 = vmatpush3.bf16.msra.mxu0 %v1415_v20 }
  0xc2   :  { %1321 = vmatprep.subr.bf16.mxu0 %v1701_v16 }
  0xc4   :  { %1286 = vmatmul.mubr.bf16.gmra.mrb[8].mxu0 %v1400_v13 }
  0xc5   :  { %1289 = vmatprep.mubr.bf16.mxu0 %v1401_v14  ;;  %1322 = vmatpush3.bf16.msra.mxu0 %v1416_v21 }
  0xc6   :  { %1323 = vmatprep.subr.bf16.mxu0 %v1701_v16 }
  0xc9   :  { %1324 = vmatpush3.bf16.msra.mxu0 %v1417_v22 }
  0xca   :  { %1325 = vmatprep.subr.bf16.mxu0 %v1701_v16 }
  0xcc   :  { %1290 = vmatmul.mubr.bf16.gmra.mrb[12].mxu0 %v1402_v15 }
  0xcd   :  { %1329 = vmatprep.mubr.msk.bf16.mxu0 %vm1702_vm0, %v1701_v16  ;;  %1326 = vmatpush3.bf16.msra.mxu0 %v1418_v23 }
  0xce   :  { %1327 = vmatprep.subr.bf16.mxu0 %v1701_v16 }
 0x187   :  { %v1279_v25 = vpop.f32.mrb[0].mxu0 }
 0x188   :  { %v340_v26 = vadd.f32 %v1279_v25, %v1943_v24  ;;  %v331_v27 = vpop.f32.mrb[1].mxu0 }
 0x189   :  { %v332_v28 = vadd.f32 %v1943_v24, %v331_v27  ;;  %v1280_v29 = vpop.f32.mrb[2].mxu0 }
 0x18a   :  { %v1149_v30 = vmul.f32 -1.442695, %v340_v26  ;;  %v343_v31 = vadd.f32 %v1280_v29, %v1943_v24  ;;  %v334_v32 = vpop.f32.mrb[3].mxu0 }
 0x18b   :  { %v1147_v33 = vmul.f32 -1.442695, %v332_v28  ;;  %v335_v34 = vadd.f32 %v1943_v24, %v334_v32 }
 0x18c   :  { %1436 = vpow2.f32 %v1149_v30  ;;  %v1150_v35 = vmul.f32 -1.442695, %v343_v31  ;;  %v1403_v30 = vld [vmem:[#allocation6] sm:$0xff]  }
 0x18d   :  { %1438 = vpow2.f32 %v1147_v33  ;;  %v1148_v36 = vmul.f32 -1.442695, %v335_v34 }
 0x18e   :  { %1440 = vpow2.f32 %v1150_v35 }
 0x18f   :  { %1442 = vpow2.f32 %v1148_v36  ;;  %v1283_v37 = vpop.f32.mrb[4].mxu0 }
 0x190   :  { %v356_v38 = vadd.f32 %v1283_v37, %v1943_v24  ;;  %v347_v39 = vpop.f32.mrb[5].mxu0 }
 0x191   :  { %v348_v40 = vadd.f32 %v1943_v24, %v347_v39  ;;  %v1284_v41 = vpop.f32.mrb[6].mxu0 }
 0x192   :  { %v1153_v42 = vmul.f32 -1.442695, %v356_v38  ;;  %v359_v43 = vadd.f32 %v1284_v41, %v1943_v24  ;;  %v350_v44 = vpop.f32.mrb[7].mxu0 }
 0x193   :  { %v1151_v45 = vmul.f32 -1.442695, %v348_v40  ;;  %v351_v46 = vadd.f32 %v1943_v24, %v350_v44 }
 0x194   :  { %1444 = vpow2.f32 %v1153_v42  ;;  %v1154_v47 = vmul.f32 -1.442695, %v359_v43 }
 0x195   :  { %1446 = vpow2.f32 %v1151_v45  ;;  %v1152_v48 = vmul.f32 -1.442695, %v351_v46 }
 0x196   :  { %v1437_v49 = vpop.eup %1436  ;;  %1448 = vpow2.f32 %v1154_v47  ;;  %v1405_v47 = vld [vmem:[#allocation6 + $0x10] sm:$0xff]  }
 0x197   :  { %v1439_v50 = vpop.eup %1438  ;;  %v444_v51 = vadd.f32 1.0, %v1437_v49  ;;  %1450 = vpow2.f32 %v1152_v48  ;;  %v1287_v52 = vpop.f32.mrb[8].mxu0 }
 0x198   :  { %v1441_v53 = vpop.eup %1440  ;;  %v442_v54 = vadd.f32 1.0, %v1439_v50  ;;  %v372_v55 = vadd.f32 %v1287_v52, %v1943_v24  ;;  %v363_v56 = vpop.f32.mrb[9].mxu0 }
 0x199   :  { %v1443_v57 = vpop.eup %1442  ;;  %1452 = vrcp.f32 %v444_v51  ;;  %v445_v58 = vadd.f32 1.0, %v1441_v53  ;;  %v364_v59 = vadd.f32 %v1943_v24, %v363_v56  ;;  %v1288_v60 = vpop.f32.mrb[10].mxu0 }
 0x19a   :  { %1454 = vrcp.f32 %v442_v54  ;;  %v443_v61 = vadd.f32 1.0, %v1443_v57  ;;  %v1157_v62 = vmul.f32 -1.442695, %v372_v55  ;;  %v375_v63 = vadd.f32 %v1288_v60, %v1943_v24  ;;  %v366_v0 = vpop.f32.mrb[11].mxu0  ;;  %v1406_v57 = vld [vmem:[#allocation6 + $0x18] sm:$0xff]  }
 0x19b   :  { %1456 = vrcp.f32 %v445_v58  ;;  %v1155_v1 = vmul.f32 -1.442695, %v364_v59  ;;  %v367_v2 = vadd.f32 %v1943_v24, %v366_v0 }
 0x19c   :  { %1458 = vrcp.f32 %v443_v61  ;;  %v1158_v3 = vmul.f32 -1.442695, %v375_v63 }
 0x19d   :  { %1460 = vpow2.f32 %v1157_v62  ;;  %v1156_v4 = vmul.f32 -1.442695, %v367_v2 }
 0x19e   :  { %v1445_v5 = vpop.eup %1444  ;;  %1462 = vpow2.f32 %v1155_v1  ;;  %v1407_v1 = vld [vmem:[#allocation6 + $0x20] sm:$0xff]  }
 0x19f   :  { %v1447_v6 = vpop.eup %1446  ;;  %v448_v7 = vadd.f32 1.0, %v1445_v5  ;;  %1464 = vpow2.f32 %v1158_v3  ;;  %v1291_v8 = vpop.f32.mrb[12].mxu0 }
 0x1a0   :  { %v1449_v9 = vpop.eup %1448  ;;  %v446_v10 = vadd.f32 1.0, %v1447_v6  ;;  %1466 = vpow2.f32 %v1156_v4  ;;  %v388_v11 = vadd.f32 %v1291_v8, %v1943_v24  ;;  %v379_v12 = vpop.f32.mrb[13].mxu0  ;;  %v1408_v6 = vld [vmem:[#allocation6 + $0x28] sm:$0xff]  }
 0x1a1   :  { %v1451_v13 = vpop.eup %1450  ;;  %1468 = vrcp.f32 %v448_v7  ;;  %v449_v14 = vadd.f32 1.0, %v1449_v9  ;;  %v380_v15 = vadd.f32 %v1943_v24, %v379_v12  ;;  %v1292_v17 = vpop.f32.mrb[14].mxu0 }
 0x1a2   :  { %1470 = vrcp.f32 %v446_v10  ;;  %v447_v18 = vadd.f32 1.0, %v1451_v13  ;;  %v1161_v19 = vmul.f32 -1.442695, %v388_v11  ;;  %v391_v20 = vadd.f32 %v1292_v17, %v1943_v24  ;;  %v382_v21 = vpop.f32.mrb[15].mxu0  ;;  %v1409_v11 = vld [vmem:[#allocation6 + $0x30] sm:$0xff]   ;;  %v1410_v17 = vld [vmem:[#allocation6 + $0x38] sm:$0xff]  }
 0x1a3   :  { %v1453_v22 = vpop.eup %1452  ;;  %1472 = vrcp.f32 %v449_v14  ;;  %v1159_v23 = vmul.f32 -1.442695, %v380_v15  ;;  %v383_v25 = vadd.f32 %v1943_v24, %v382_v21  ;;  %v1404_v24 = vld [vmem:[#allocation6 + $0x8] sm:$0xff]   ;;  %v1206_v21 = vld [vmem:[%s2035_s5] sm:$0xff]  }
 0x1a4   :  { %v1455_v26 = vpop.eup %1454  ;;  %1474 = vrcp.f32 %v447_v18  ;;  %v1162_v27 = vmul.f32 -1.442695, %v391_v20  ;;  %v1419_v20 = vld [vmem:[#allocation11 + $0x38] sm:$0xff]  }
 0x1a5   :  { %v1457_v28 = vpop.eup %1456  ;;  %1476 = vpow2.f32 %v1161_v19  ;;  %v1160_v29 = vmul.f32 -1.442695, %v383_v25  ;;  %v1411_v19 = vld [vmem:[#allocation8] sm:$0xff]   ;;  %1328 = vmatpush3.bf16.msra.mxu0 %v1419_v20  ;;  %v1432_v20 = vld [vmem:[#allocation14 + $0x20] sm:$0xff]  }
 0x1a6   :  { %v1459_v31 = vpop.eup %1458  ;;  %1478 = vpow2.f32 %v1159_v23  ;;  %v491_v32 = vpack.c.bf16 %v1457_v28, %v1453_v22  ;;  %1353 = vmatprep.subr.bf16.mxu0 %v1701_v16  ;;  %v1207_v22 = vunpack.c.l.bf16 %v1206_v21  ;;  %v1208_v23 = vunpack.c.h.bf16 %v1206_v21  ;;  %v1433_v21 = vld [vmem:[#allocation14 + $0x28] sm:$0xff]  }
 0x1a7   :  { %v1461_v33 = vpop.eup %1460  ;;  %1480 = vpow2.f32 %v1162_v27  ;;  %v490_v34 = vpack.c.bf16 %v1459_v31, %v1455_v26 }
 0x1a8   :  { %v1463_v35 = vpop.eup %1462  ;;  %v452_v36 = vadd.f32 1.0, %v1461_v33  ;;  %1482 = vpow2.f32 %v1160_v29  ;;  %v563_v46 = vmul.bf16 %v1404_v24, %v491_v32  ;;  %v1420_v32 = vld [vmem:[#allocation12] sm:$0xff]   ;;  %v1421_v33 = vld [vmem:[#allocation12 + $0x8] sm:$0xff]   ;;  %v1172_v24 = vld [vmem:[%s2037_s7] ss:$0 sm:$0xff] }
 0x1a9   :  { %v1465_v37 = vpop.eup %1464  ;;  %v450_v38 = vadd.f32 1.0, %v1463_v35  ;;  %v562_v39 = vmul.bf16 %v1403_v30, %v490_v34  ;;  %v1422_v34 = vld [vmem:[#allocation12 + $0x10] sm:$0xff]   ;;  %v1423_v35 = vld [vmem:[#allocation12 + $0x18] sm:$0xff]  }
 0x1aa   :  { %v1467_v40 = vpop.eup %1466  ;;  %1484 = vrcp.f32 %v452_v36  ;;  %v453_v41 = vadd.f32 1.0, %v1465_v37  ;;  %v1424_v36 = vld [vmem:[#allocation12 + $0x20] sm:$0xff]   ;;  %v1425_v37 = vld [vmem:[#allocation12 + $0x28] sm:$0xff]  }
 0x1ab   :  { %v1469_v42 = vpop.eup %1468  ;;  %1486 = vrcp.f32 %v450_v38  ;;  %v451_v43 = vadd.f32 1.0, %v1467_v40  ;;  %1294 = vmatpush3.bf16.msra.mxu1 %v562_v39  ;;  %v1426_v38 = vld [vmem:[#allocation12 + $0x30] sm:$0xff]   ;;  %v1427_v39 = vld [vmem:[#allocation12 + $0x38] sm:$0xff]  }
 0x1ac   :  { %v1471_v44 = vpop.eup %1470  ;;  %1488 = vrcp.f32 %v453_v41  ;;  %1295 = vmatprep.subr.bf16.mxu1 %v1701_v16 }
 0x1ad   :  { %v1473_v45 = vpop.eup %1472  ;;  %1490 = vrcp.f32 %v451_v43 }
 0x1ae   :  { %v1475_v48 = vpop.eup %1474  ;;  %v493_v49 = vpack.c.bf16 %v1473_v45, %v1469_v42 }
 0x1af   :  { %v1477_v50 = vpop.eup %1476  ;;  %1296 = vmatpush3.bf16.msra.mxu1 %v563_v46  ;;  %v492_v51 = vpack.c.bf16 %v1475_v48, %v1471_v44 }
 0x1b0   :  { %v1479_v52 = vpop.eup %1478  ;;  %v456_v53 = vadd.f32 1.0, %v1477_v50  ;;  %1297 = vmatprep.subr.bf16.mxu1 %v1701_v16  ;;  %v565_v63 = vmul.bf16 %v1406_v57, %v493_v49 }
 0x1b1   :  { %v1481_v54 = vpop.eup %1480  ;;  %v454_v55 = vadd.f32 1.0, %v1479_v52  ;;  %v564_v56 = vmul.bf16 %v1405_v47, %v492_v51 }
 0x1b2   :  { %v1483_v58 = vpop.eup %1482  ;;  %1492 = vrcp.f32 %v456_v53  ;;  %v457_v59 = vadd.f32 1.0, %v1481_v54 }
 0x1b3   :  { %1494 = vrcp.f32 %v454_v55  ;;  %v455_v60 = vadd.f32 1.0, %v1483_v58  ;;  %1298 = vmatpush3.bf16.msra.mxu1 %v564_v56 }
 0x1b4   :  { %v1485_v61 = vpop.eup %1484  ;;  %1496 = vrcp.f32 %v457_v59  ;;  %1299 = vmatprep.subr.bf16.mxu1 %v1701_v16 }
 0x1b5   :  { %v1487_v62 = vpop.eup %1486  ;;  %1498 = vrcp.f32 %v455_v60 }
 0x1b6   :  { %v1489_v0 = vpop.eup %1488 }
 0x1b7   :  { %v1491_v2 = vpop.eup %1490  ;;  %1300 = vmatpush3.bf16.msra.mxu1 %v565_v63  ;;  %v495_v3 = vpack.c.bf16 %v1489_v0, %v1485_v61 }
 0x1b8   :  { %1301 = vmatprep.subr.bf16.mxu1 %v1701_v16  ;;  %v494_v4 = vpack.c.bf16 %v1491_v2, %v1487_v62 }
 0x1b9   :  { %v567_v10 = vmul.bf16 %v1408_v6, %v495_v3 }
 0x1ba   :  { %v566_v5 = vmul.bf16 %v1407_v1, %v494_v4  ;;  %v1181_v4 = vld [vmem:[%s2038_s8] ss:$0 sm:$0xff] }
 0x1bc   :  { %v1493_v7 = vpop.eup %1492  ;;  %1302 = vmatpush3.bf16.msra.mxu1 %v566_v5 }
 0x1bd   :  { %v1495_v8 = vpop.eup %1494  ;;  %1303 = vmatprep.subr.bf16.mxu1 %v1701_v16 }
 0x1be   :  { %v1497_v9 = vpop.eup %1496 }
 0x1bf   :  { %v1499_v12 = vpop.eup %1498  ;;  %v497_v13 = vpack.c.bf16 %v1497_v9, %v1493_v7  ;;  %v1182_v7 = vld [vmem:[%s2039_s9] ss:$0 sm:$0xff] }
 0x1c0   :  { %1304 = vmatpush3.bf16.msra.mxu1 %v567_v10  ;;  %v496_v14 = vpack.c.bf16 %v1499_v12, %v1495_v8 }
 0x1c1   :  { %1305 = vmatprep.subr.bf16.mxu1 %v1701_v16  ;;  %v569_v18 = vmul.bf16 %v1410_v17, %v497_v13  ;;  %v1429_v17 = vld [vmem:[#allocation14 + $0x8] sm:$0xff]  }
 0x1c2   :  { %v568_v15 = vmul.bf16 %v1409_v11, %v496_v14 }
 0x1c4   :  { %1306 = vmatpush3.bf16.msra.mxu1 %v568_v15  ;;  %v1428_v15 = vld [vmem:[#allocation14] sm:$0xff]  }
 0x1c5   :  { %1307 = vmatprep.subr.bf16.mxu1 %v1701_v16 }
 0x1c8   :  { %1308 = vmatpush3.bf16.msra.mxu1 %v569_v18  ;;  %v1430_v18 = vld [vmem:[#allocation14 + $0x10] sm:$0xff]  }
 0x1c9   :  { %1333 = vmatprep.subr.bf16.mxu1 %v1701_v16 }
 0x1cb   :  { %1310 = vmatmul.mubr.bf16.vlgmr.msra.gmra.mrb[0].mxu1 %v1411_v19  ;;  %v1431_v19 = vld [vmem:[#allocation14 + $0x18] sm:$0xff]  }
 0x1cc   :  { %1349 = vmatprep.mubr.msk.bf16.mxu1 %vm1702_vm0, %v1701_v16  ;;  %1334 = vmatpush3.bf16.msra.mxu1 %v1420_v32 }
 0x1cd   :  { %1335 = vmatprep.subr.bf16.mxu1 %v1701_v16 }
 0x1d0   :  { %1336 = vmatpush3.bf16.msra.mxu1 %v1421_v33 }
 0x1d1   :  { %1337 = vmatprep.subr.bf16.mxu1 %v1701_v16 }
 0x1d4   :  { %1338 = vmatpush3.bf16.msra.mxu1 %v1422_v34 }
 0x1d5   :  { %1339 = vmatprep.subr.bf16.mxu1 %v1701_v16 }
 0x1d8   :  { %1340 = vmatpush3.bf16.msra.mxu1 %v1423_v35 }
 0x1d9   :  { %1341 = vmatprep.subr.bf16.mxu1 %v1701_v16 }
 0x1dc   :  { %1342 = vmatpush3.bf16.msra.mxu1 %v1424_v36 }
 0x1dd   :  { %1343 = vmatprep.subr.bf16.mxu1 %v1701_v16 }
 0x1e0   :  { %1344 = vmatpush3.bf16.msra.mxu1 %v1425_v37 }
 0x1e1   :  { %1345 = vmatprep.subr.bf16.mxu1 %v1701_v16 }
 0x1e4   :  { %1346 = vmatpush3.bf16.msra.mxu1 %v1426_v38 }
 0x1e5   :  { %1347 = vmatprep.subr.bf16.mxu1 %v1701_v16 }
 0x1e8   :  { %1348 = vmatpush3.bf16.msra.mxu1 %v1427_v39 }
 0x29e   :  { %v614_v25 = vpop.f32.mrb[0].mxu1 }
 0x29f   :  { %v1311_v26 = vpop.f32.mrb[1].mxu1  ;;  %v634_v28 = vadd.f32 %v1207_v22, %v614_v25  ;;  %v1434_v22 = vld [vmem:[#allocation14 + $0x30] sm:$0xff]   ;;  %v1183_v25 = vld [vmem:[%s2041_s11] ss:$0 sm:$0xff] }
 0x2a0   :  { %v617_v27 = vpop.f32.mrb[2].mxu1 }
 0x2a1   :  { %v635_v29 = vadd.f32 %v1208_v23, %v617_v27  ;;  %v1312_v30 = vpop.f32.mrb[3].mxu1  ;;  %v1435_v23 = vld [vmem:[#allocation14 + $0x38] sm:$0xff]  }
 0x2a3   :  { %v636_v31 = vpack.c.bf16 %v635_v29, %v634_v28 }
 0x2a5   :  { %1330 = vmatmul.mubr.bf16.vlgmr.msra.gmra.mrb[16].mxu0 %v636_v31 }
 0x2a6   :  { %1369 = vmatprep.mubr.msk.bf16.mxu0 %vm1702_vm0, %v1701_v16  ;;  %1354 = vmatpush3.bf16.msra.mxu0 %v1428_v15 }
 0x2a7   :  { %1355 = vmatprep.subr.bf16.mxu0 %v1701_v16 }
 0x2aa   :  { %1356 = vmatpush3.bf16.msra.mxu0 %v1429_v17 }
 0x2ab   :  { %1357 = vmatprep.subr.bf16.mxu0 %v1701_v16 }
 0x2ae   :  { %1358 = vmatpush3.bf16.msra.mxu0 %v1430_v18 }
 0x2af   :  { %1359 = vmatprep.subr.bf16.mxu0 %v1701_v16 }
 0x2b2   :  { %1360 = vmatpush3.bf16.msra.mxu0 %v1431_v19 }
 0x2b3   :  { %1361 = vmatprep.subr.bf16.mxu0 %v1701_v16 }
 0x2b6   :  { %1362 = vmatpush3.bf16.msra.mxu0 %v1432_v20 }
 0x2b7   :  { %1363 = vmatprep.subr.bf16.mxu0 %v1701_v16 }
 0x2ba   :  { %1364 = vmatpush3.bf16.msra.mxu0 %v1433_v21 }
 0x2bb   :  { %1365 = vmatprep.subr.bf16.mxu0 %v1701_v16 }
 0x2be   :  { %1366 = vmatpush3.bf16.msra.mxu0 %v1434_v22 }
 0x2bf   :  { %1367 = vmatprep.subr.bf16.mxu0 %v1701_v16 }
 0x2c2   :  { %1368 = vmatpush3.bf16.msra.mxu0 %v1435_v23 }
 0x378   :  { %v742_v40 = vpop.f32.mrb[16].mxu0 }
 0x379   :  { %v1331_v41 = vpop.f32.mrb[17].mxu0  ;;  %v743_v43 = vadd.f32 %v1172_v24, %v742_v40 }
 0x37a   :  { %v745_v42 = vpop.f32.mrb[18].mxu0 }
 0x37b   :  { %v746_v44 = vadd.f32 %v1172_v24, %v745_v42  ;;  %v1332_v45 = vpop.f32.mrb[19].mxu0 }
 0x37d   :  { %v749_v46 = vadd.f32 %v746_v44, %v743_v43 }
 0x37f   :  { %v750_v47 = vrot.slane %v749_v46, 4 }
 0x381   :  { %v751_v48 = vadd.f32 %v750_v47, %v749_v46 }
 0x383   :  { %v752_v49 = vrot.slane %v751_v48, 2 }
 0x385   :  { %v753_v50 = vadd.f32 %v752_v49, %v751_v48 }
 0x387   :  { %v754_v51 = vrot.slane %v753_v50, 1 }
 0x389   :  { %v755_v52 = vadd.f32 %v754_v51, %v753_v50 }
 0x38b   :  { %v757_v53 = vmul.f32 0.0625, %v755_v52  ;;  %v1192_v52 = vld [vmem:[%s2042_s12] ss:$0 sm:$0xff] }
 0x38d   :  { %v758_v54 = vsub.f32 %v743_v43, %v757_v53  ;;  %v759_v55 = vsub.f32 %v746_v44, %v757_v53 }
 0x38f   :  { %v760_v56 = vmul.f32 %v758_v54, %v758_v54  ;;  %v761_v57 = vmul.f32 %v759_v55, %v759_v55 }
 0x391   :  { %v762_v58 = vadd.f32 %v761_v57, %v760_v56 }
 0x393   :  { %v763_v59 = vrot.slane %v762_v58, 4 }
 0x395   :  { %v764_v60 = vadd.f32 %v763_v59, %v762_v58 }
 0x397   :  { %v765_v61 = vrot.slane %v764_v60, 2 }
 0x399   :  { %v766_v62 = vadd.f32 %v765_v61, %v764_v60 }
 0x39b   :  { %v767_v63 = vrot.slane %v766_v62, 1 }
 0x39d   :  { %v768_v0 = vadd.f32 %v767_v63, %v766_v62  ;;  %v1194_v63 = vld [vmem:[%s2045_s15] ss:$0 sm:$0xff] }
 0x39f   :  { %v769_v1 = vmul.f32 0.0625, %v768_v0 }
 0x3a1   :  { %v770_v2 = vadd.f32 1e-05, %v769_v1 }
 0x3a3   :  { %1500 = vrsqrt.f32 %v770_v2 }
 0x3ad   :  { %v1501_v3 = vpop.eup %1500 }
 0x3ae   :  { %v772_v5 = vmul.f32 %v1501_v3, %v758_v54  ;;  %v773_v6 = vmul.f32 %v1501_v3, %v759_v55  ;;  %v1193_v55 = vld [vmem:[%s2043_s13] ss:$0 sm:$0xff] }
 0x3b0   :  { %v781_v8 = vmul.f32 %v1181_v4, %v772_v5  ;;  %v782_v9 = vmul.f32 %v1181_v4, %v773_v6 }
 0x3b2   :  { %v791_v10 = vadd.f32 %v1182_v7, %v782_v9  ;;  %v790_v11 = vadd.f32 %v1182_v7, %v781_v8 }
 0x3b4   :  { %v793_v12 = vmax.f32 %v791_v10, 0.0  ;;  %v792_v13 = vmax.f32 %v790_v11, 0.0 }
 0x3b6   :  { %v794_v14 = vpack.c.bf16 %v793_v12, %v792_v13 }
 0x3b8   :  { %1350 = vmatmul.mubr.bf16.vlgmr.msra.gmra.mrb[4].mxu1 %v794_v14 }
 0x48b   :  { %v900_v26 = vpop.f32.mrb[4].mxu1 }
 0x48c   :  { %v1351_v27 = vpop.f32.mrb[5].mxu1  ;;  %v901_v29 = vadd.f32 %v1183_v25, %v900_v26 }
 0x48d   :  { %v903_v28 = vpop.f32.mrb[6].mxu1 }
 0x48e   :  { %v904_v30 = vadd.f32 %v1183_v25, %v903_v28  ;;  %v1352_v31 = vpop.f32.mrb[7].mxu1 }
 0x490   :  { %v907_v32 = vadd.f32 %v904_v30, %v901_v29 }
 0x492   :  { %v908_v33 = vrot.slane %v907_v32, 4 }
 0x494   :  { %v909_v34 = vadd.f32 %v908_v33, %v907_v32  ;;  %v1204_v33 = vld [vmem:[%s2047_s17] ss:$0 sm:$0xff] }
 0x496   :  { %v910_v35 = vrot.slane %v909_v34, 2 }
 0x498   :  { %v911_v36 = vadd.f32 %v910_v35, %v909_v34 }
 0x49a   :  { %v912_v37 = vrot.slane %v911_v36, 1 }
 0x49c   :  { %v913_v38 = vadd.f32 %v912_v37, %v911_v36 }
 0x49e   :  { %v914_v16 = vmul.f32 0.0625, %v913_v38 }
 0x4a0   :  { %v915_v39 = vsub.f32 %v901_v29, %v914_v16  ;;  %v916_v24 = vsub.f32 %v904_v30, %v914_v16  ;;  %v1203_v30 = vld [vmem:[%s2046_s16] ss:$0 sm:$0xff] }
 0x4a2   :  { %v917_v40 = vmul.f32 %v915_v39, %v915_v39  ;;  %v918_v41 = vmul.f32 %v916_v24, %v916_v24 }
 0x4a4   :  { %v919_v42 = vadd.f32 %v918_v41, %v917_v40 }
 0x4a6   :  { %v920_v43 = vrot.slane %v919_v42, 4 }
 0x4a8   :  { %v921_v44 = vadd.f32 %v920_v43, %v919_v42 }
 0x4aa   :  { %v922_v45 = vrot.slane %v921_v44, 2 }
 0x4ac   :  { %v923_v46 = vadd.f32 %v922_v45, %v921_v44 }
 0x4ae   :  { %v924_v47 = vrot.slane %v923_v46, 1 }
 0x4b0   :  { %v925_v48 = vadd.f32 %v924_v47, %v923_v46 }
 0x4b2   :  { %v926_v49 = vmul.f32 0.0625, %v925_v48 }
 0x4b4   :  { %v927_v50 = vadd.f32 1e-05, %v926_v49 }
 0x4b6   :  { %1502 = vrsqrt.f32 %v927_v50 }
 0x4c0   :  { %v1503_v51 = vpop.eup %1502 }
 0x4c1   :  { %v929_v53 = vmul.f32 %v1503_v51, %v915_v39  ;;  %v930_v54 = vmul.f32 %v1503_v51, %v916_v24 }
 0x4c3   :  { %v938_v56 = vmul.f32 %v1192_v52, %v929_v53  ;;  %v939_v57 = vmul.f32 %v1192_v52, %v930_v54 }
 0x4c5   :  { %v948_v58 = vadd.f32 %v1193_v55, %v939_v57  ;;  %v947_v59 = vadd.f32 %v1193_v55, %v938_v56 }
 0x4c7   :  { %v950_v60 = vmax.f32 %v948_v58, 0.0  ;;  %v949_v61 = vmax.f32 %v947_v59, 0.0 }
 0x4c9   :  { %v951_v62 = vpack.c.bf16 %v950_v60, %v949_v61 }
 0x4cb   :  { %1370 = vmatmul.mubr.bf16.vlgmr.msra.gmra.mrb[20].mxu0 %v951_v62 }
 0x59e   :  { %v1057_v0 = vpop.f32.mrb[20].mxu0 }
 0x59f   :  { %v1371_v1 = vpop.f32.mrb[21].mxu0  ;;  %v1058_v3 = vadd.f32 %v1194_v63, %v1057_v0 }
 0x5a0   :  { %v1060_v2 = vpop.f32.mrb[22].mxu0 }
 0x5a1   :  { %v1061_v4 = vadd.f32 %v1194_v63, %v1060_v2  ;;  %v1372_v5 = vpop.f32.mrb[23].mxu0 }
 0x5a3   :  { %v1064_v6 = vadd.f32 %v1061_v4, %v1058_v3 }
 0x5a5   :  { %v1065_v7 = vrot.slane %v1064_v6, 4 }
 0x5a7   :  { %v1066_v8 = vadd.f32 %v1065_v7, %v1064_v6 }
 0x5a9   :  { %v1067_v9 = vrot.slane %v1066_v8, 2 }
 0x5ab   :  { %v1068_v10 = vadd.f32 %v1067_v9, %v1066_v8 }
 0x5ad   :  { %v1069_v11 = vrot.slane %v1068_v10, 1 }
 0x5af   :  { %v1070_v12 = vadd.f32 %v1069_v11, %v1068_v10 }
 0x5b1   :  { %v1071_v13 = vmul.f32 0.0625, %v1070_v12 }
 0x5b3   :  { %v1072_v14 = vsub.f32 %v1058_v3, %v1071_v13  ;;  %v1073_v15 = vsub.f32 %v1061_v4, %v1071_v13 }
 0x5b5   :  { %v1074_v17 = vmul.f32 %v1072_v14, %v1072_v14  ;;  %v1075_v18 = vmul.f32 %v1073_v15, %v1073_v15 }
 0x5b7   :  { %v1076_v19 = vadd.f32 %v1075_v18, %v1074_v17 }
 0x5b9   :  { %v1077_v20 = vrot.slane %v1076_v19, 4 }
 0x5bb   :  { %v1078_v21 = vadd.f32 %v1077_v20, %v1076_v19 }
 0x5bd   :  { %v1079_v22 = vrot.slane %v1078_v21, 2 }
 0x5bf   :  { %v1080_v23 = vadd.f32 %v1079_v22, %v1078_v21 }
 0x5c1   :  { %v1081_v25 = vrot.slane %v1080_v23, 1 }
 0x5c3   :  { %v1082_v26 = vadd.f32 %v1081_v25, %v1080_v23 }
 0x5c5   :  { %v1083_v27 = vmul.f32 0.0625, %v1082_v26 }
 0x5c7   :  { %v1084_v28 = vadd.f32 1e-05, %v1083_v27 }
 0x5c9   :  { %1504 = vrsqrt.f32 %v1084_v28 }
 0x5d3   :  { %v1505_v29 = vpop.eup %1504 }
 0x5d4   :  { %v1086_v31 = vmul.f32 %v1505_v29, %v1072_v14  ;;  %v1087_v32 = vmul.f32 %v1505_v29, %v1073_v15 }
 0x5d6   :  { %v1095_v34 = vmul.f32 %v1203_v30, %v1086_v31  ;;  %v1096_v35 = vmul.f32 %v1203_v30, %v1087_v32 }
 0x5d8   :  { %v1104_v36 = vadd.f32 %v1204_v33, %v1095_v34  ;;  %v1105_v37 = vadd.f32 %v1204_v33, %v1096_v35 }
 0x5da   :  { %v1107_v38 = vmax.f32 %v1105_v37, 0.0  ;;  %v1106_v16 = vmax.f32 %v1104_v36, 0.0 }
 0x5dc   :  { %1109 = vst [vmem:[#allocation15 + $0x8] sm:$0xff] %v1107_v38  ;;  %1108 = vst [vmem:[#allocation15] sm:$0xff] %v1106_v16 }
 0x5dd   :  { %1671 = shalt.err (!%p1668_p4)
}
 0x5de   :  { %s2060_s1 = sld [smem:[#allocation24_spill]] }
 0x5e4   :  { %s1672_s27 = scalar_lea.hbm %s2060_s1, 256 }
 0x5e5   :  { %p1673_p5 = scmp.ne.s32.totalorder %s2060_s1, %s1672_s27  ;;  %p1676_p6 = scmp.lt.u32.totalorder %s1672_s27, %s2060_s1 }
 0x5e7   :  { %p1678_p7 = pnand %p1676_p6, %p1673_p5 }
 0x5e9   :  { %1681 = shalt.err (!%p1678_p7)
}
 0x5ea   :  { %s1704_s4 = smov 128   ;;  %s1705_s26 = smov 8  }
 0x5eb   :  { %1121 = dma.vmem_to_hbm [thread:$0]  %s1116_s24, 256, %s2060_s1, [#allocation5], %s1704_s4, %s1704_s4, %s1705_s26  }
 0x5ec   :  { %1690 = dma.done.wait [#allocation5], 256  }
 0x5ed   :  { %1691 = vsyncadd [#allocation5], 4294967040 }
 0x5ee   :  { %1125 = vsyncpa [#allocation4], 1 }
 0x5ef   :  { %1126 = vsyncpa [#allocation7], 1 }
 0x5f0   :  { %1127 = vsyncpa [#allocation10], 1 }
 0x5f1   :  { %1128 = vsyncpa [#allocation13], 1 }
 0x5f2   :  { %1129 = vsyncpa [#allocation5], 1 }

</bundles_post_ra>
